<compile_context>
chip_gen: v7x
topology: tpu7x:2x2x1
jax: 0.10.0
libtpu: 0.0.40
codegen_flags: <defaults>
</compile_context>

<pallas_src>
import numpy as np
import jax
import jax.numpy as jnp
from jax.experimental import pallas as pl
from jax.experimental.pallas import tpu as pltpu


def _transition_kernel(x_ref, scale_ref, bias_ref, w_ref, o_ref):
    """One row-tile of the fused BN -> ReLU -> 1x1 conv (2x2 avg-pool folded into K).

    x_ref:     (Mt, 4C)   bf16  rows = output pixels (n, ho, wo); lanes = the four pool
                                taps' channels concatenated: [(0,0) | (0,1) | (1,0) | (1,1)]
    scale_ref: (1, 4C)    f32   folded BatchNorm scale, tiled over the 4 taps (resident)
    bias_ref:  (1, 4C)    f32   folded BatchNorm bias,  tiled over the 4 taps (resident)
    w_ref:     (4C, Cpad) bf16  1x1-conv weight stacked 4x, 0.25 pool factor folded in (resident)
    o_ref:     (Mt, Cpad) f32   lane-dense output tile
    """
    x = x_ref[...].astype(jnp.float32)                         # upcast in-register (v5e: no bf16 VPU)
    z = jnp.maximum(x * scale_ref[...] + bias_ref[...], 0.0)   # BN + ReLU (VPU)
    o_ref[...] = jnp.dot(z.astype(jnp.bfloat16), w_ref[...],
                         preferred_element_type=jnp.float32).astype(o_ref.dtype)


def _vmem_budgets():
    """Generation-aware VMEM budgets (v5e/v6e: 128 MiB physical, v7x: 64 MiB per TC)."""
    phys = 64 * 1024 * 1024                     # conservative (v7x-safe) fallback
    try:
        info = pltpu.get_tpu_info()
        phys = int(getattr(info, "vmem_capacity_bytes", phys)) or phys
    except Exception:
        pass
    tile_budget = min(phys // 3, 48 * 1024 * 1024)     # double-buffered in+out tiles + residents
    vmem_limit = min(int(phys * 0.75), 96 * 1024 * 1024)
    return tile_budget, vmem_limit, phys


def _pick_row_tile(m_total, c4, cpad, budget_bytes):
    """Largest row-tile Mt (multiple of 8, dividing m_total) whose double-buffered
    bf16-in + f32-out tiles plus residents fit the budget; prefers MXU-friendly
    multiples of 256 / 128 when that costs at most 2x tile size."""
    resident = 2 * (c4 * cpad * 2) + 4 * c4 * 4          # weight (bf16, 2 bufs) + scale/bias

    def tile_bytes(m):
        return resident + 2 * (m * c4 * 2 + m * cpad * 4)

    cands = [m for m in range(8, m_total + 1, 8) if m_total % m == 0] or [m_total]
    feas = [m for m in cands if tile_bytes(m) <= budget_bytes]
    if not feas:                                         # graceful degrade: smallest tile,
        m = min(cands)                                   # caller raises vmem_limit to cover it
        return m, tile_bytes(m)
    best = max(feas)
    for align in (256, 128):
        aligned = [m for m in feas if m % align == 0 and m * 2 >= best]
        if aligned:
            best = max(aligned)
            break
    return best, tile_bytes(best)


def transition_layer(x_nchw, gamma, beta, conv_w, eps=1e-5):
    """x_nchw: (N, Cin, H, W) f32; conv_w: (Cout, Cin, 1, 1). Returns NCHW f32 output.
    Matches PyTorch training-mode BatchNorm (batch statistics)."""
    N, C, H, W = x_nchw.shape
    Cout = conv_w.shape[0]
    assert H % 2 == 0 and W % 2 == 0, "AvgPool2d(2,2) path assumes even H, W"
    Ho, Wo = H // 2, W // 2
    M = N * Ho * Wo                              # one row per output pixel (N folded in)
    C4 = 4 * C                                   # all four pool taps in the contraction dim
    Cpad = ((Cout + 127) // 128) * 128           # lane-dense output stores

    # --- single wrapper relayout: NCHW f32 -> (M, 4C) bf16, pool taps folded into lanes.
    #     x is read from HBM exactly once (here); stats and the kernel consume the
    #     half-size bf16 copy.
    x6 = x_nchw.astype(jnp.float32).reshape(N, C, Ho, 2, Wo, 2)
    xq = jnp.transpose(x6, (0, 2, 4, 3, 5, 1)).reshape(M, C4).astype(jnp.bfloat16)

    # --- training-mode BatchNorm stats from the (self-consistent) bf16 copy, one fused
    #     pass (E[x], E[x^2]) in f32.  NOTE: one-pass variance can lose precision when
    #     |mean| >> std; acceptable for BN-scale activations.
    xq32 = xq.astype(jnp.float32)
    m4 = jnp.mean(xq32, axis=0)                          # per (tap, channel) mean
    e24 = jnp.mean(xq32 * xq32, axis=0)                  # per (tap, channel) second moment
    mean = jnp.mean(m4.reshape(4, C), axis=0)            # taps have equal counts
    ex2 = jnp.mean(e24.reshape(4, C), axis=0)
    var = jnp.maximum(ex2 - mean * mean, 0.0)
    scale = gamma.astype(jnp.float32) / jnp.sqrt(var + eps)
    bias = beta.astype(jnp.float32) - mean * scale
    scale4 = jnp.tile(scale, 4).reshape(1, C4)
    bias4 = jnp.tile(bias, 4).reshape(1, C4)

    # --- conv weight: (C, Cout) stacked 4x (folds the 2x2 pool sum), 0.25 average factor
    #     folded in, zero-padded to lane-dense Cpad, bf16 for the MXU.
    w = jnp.transpose(conv_w.reshape(Cout, C).astype(jnp.float32), (1, 0))   # (C, Cout)
    w4 = jnp.concatenate([w, w, w, w], axis=0) * 0.25                        # (4C, Cout)
    w4 = jnp.pad(w4, ((0, 0), (0, Cpad - Cout))).astype(jnp.bfloat16)        # (4C, Cpad)

    tile_budget, vmem_limit, phys = _vmem_budgets()
    Mt, need_bytes = _pick_row_tile(M, C4, Cpad, tile_budget)
    vmem_limit = max(vmem_limit, min(need_bytes + (4 << 20), int(phys * 0.9)))

    grid = (M // Mt,)
    out = pl.pallas_call(
        _transition_kernel,
        out_shape=jax.ShapeDtypeStruct((M, Cpad), jnp.float32),
        grid=grid,
        in_specs=[
            pl.BlockSpec((Mt, C4), lambda s: (s, 0)),      # activation row tile (bf16)
            pl.BlockSpec((1, C4), lambda s: (0, 0)),       # BN scale (resident)
            pl.BlockSpec((1, C4), lambda s: (0, 0)),       # BN bias  (resident)
            pl.BlockSpec((C4, Cpad), lambda s: (0, 0)),    # conv weight (resident)
        ],
        out_specs=pl.BlockSpec((Mt, Cpad), lambda s: (s, 0)),
        compiler_params=pltpu.CompilerParams(
            dimension_semantics=("parallel",),
            vmem_limit_bytes=int(vmem_limit),
        ),
    )(xq, scale4, bias4, w4)

    # drop lane padding, back to NCHW (small tensor): (M, Cpad) -> (N, Cout, Ho, Wo)
    out = out[:, :Cout].reshape(N, Ho, Wo, Cout)
    return jnp.transpose(out, (0, 3, 1, 2))


def _reference(x_nchw, gamma, beta, conv_w, eps=1e-5):
    """Plain-JAX f32 reference matching PyTorch TransitionLayer.forward (training-mode BN)."""
    N, C, H, W = x_nchw.shape
    Cout = conv_w.shape[0]
    mean = jnp.mean(x_nchw, axis=(0, 2, 3))
    var = jnp.mean((x_nchw - mean[None, :, None, None]) ** 2, axis=(0, 2, 3))
    xn = (x_nchw - mean[None, :, None, None]) / jnp.sqrt(var[None, :, None, None] + eps)
    z = jnp.maximum(xn * gamma[None, :, None, None] + beta[None, :, None, None], 0.0)
    y = jnp.einsum("nchw,oc->nohw", z, conv_w.reshape(Cout, C))
    y = y.reshape(N, Cout, H // 2, 2, W // 2, 2).mean(axis=(3, 5))
    return y


if __name__ == "__main__":
    # DenseNet transition with compression: in_channels=8, theta=0.5 -> out_channels=4
    N, Cin, H, W = 2, 8, 16, 16
    theta = 0.5
    Cout = int(theta * Cin)

    key = jax.random.PRNGKey(0)
    kx, kg, kb, kw = jax.random.split(key, 4)
    x = jax.random.normal(kx, (N, Cin, H, W), dtype=jnp.float32)
    gamma = jax.random.normal(kg, (Cin,), dtype=jnp.float32) * 0.1 + 1.0
    beta = jax.random.normal(kb, (Cin,), dtype=jnp.float32) * 0.1
    conv_w = jax.random.normal(kw, (Cout, Cin, 1, 1), dtype=jnp.float32) * 0.2

    fn = jax.jit(transition_layer)
    out = jax.block_until_ready(fn(x, gamma, beta, conv_w))
    ref = jax.block_until_ready(_reference(x, gamma, beta, conv_w))

    assert out.shape == (N, Cout, H // 2, W // 2), out.shape
    # Tolerance reflects the bf16 activation/weight datapath (f32 accumulate) vs. f32 ref.
    np.testing.assert_allclose(np.asarray(out), np.asarray(ref), rtol=3e-2, atol=3e-2)
    print("KERNEL_OK")
</pallas_src>

<mosaic_0001>
module attributes {stable_mosaic.version = 11 : i64} {
  func.func @_transition_kernel(%arg0: i32, %arg1: memref<128x32xbf16, #tpu.memory_space<vmem>>, %arg2: memref<1x32xf32, #tpu.memory_space<vmem>>, %arg3: memref<1x32xf32, #tpu.memory_space<vmem>>, %arg4: memref<32x128xbf16, #tpu.memory_space<vmem>>, %arg5: memref<128x128xf32, #tpu.memory_space<vmem>>) attributes {dimension_semantics = [#tpu.dimension_semantics<parallel>], iteration_bounds = array<i64: 1>, scalar_prefetch = 0 : i64, scratch_operands = 0 : i64, tpu.core_type = #tpu.core_type<tc>, window_params = [{transform_indices = @transform_0, window_bounds = array<i64: 128, 32>}, {pipeline_mode = #tpu.pipeline_mode<synchronous>, transform_indices = @transform_1, window_bounds = array<i64: 1, 32>}, {pipeline_mode = #tpu.pipeline_mode<synchronous>, transform_indices = @transform_2, window_bounds = array<i64: 1, 32>}, {pipeline_mode = #tpu.pipeline_mode<synchronous>, transform_indices = @transform_3, window_bounds = array<i64: 32, 128>}, {transform_indices = @transform_4, window_bounds = array<i64: 128, 128>}]} {
    %c0 = arith.constant 0 : index
    %c0_0 = arith.constant 0 : index
    %0 = vector.load %arg1[%c0, %c0_0] : memref<128x32xbf16, #tpu.memory_space<vmem>>, vector<128x32xbf16>
    %1 = arith.extf %0 : vector<128x32xbf16> to vector<128x32xf32>
    %c0_1 = arith.constant 0 : index
    %c0_2 = arith.constant 0 : index
    %2 = vector.load %arg2[%c0_1, %c0_2] : memref<1x32xf32, #tpu.memory_space<vmem>>, vector<1x32xf32>
    %3 = vector.broadcast %2 : vector<1x32xf32> to vector<128x32xf32>
    %4 = arith.mulf %1, %3 : vector<128x32xf32>
    %c0_3 = arith.constant 0 : index
    %c0_4 = arith.constant 0 : index
    %5 = vector.load %arg3[%c0_3, %c0_4] : memref<1x32xf32, #tpu.memory_space<vmem>>, vector<1x32xf32>
    %6 = vector.broadcast %5 : vector<1x32xf32> to vector<128x32xf32>
    %7 = arith.addf %4, %6 : vector<128x32xf32>
    %cst = arith.constant 0.000000e+00 : f32
    %8 = vector.broadcast %cst : f32 to vector<128x32xf32>
    %9 = arith.maximumf %7, %8 : vector<128x32xf32>
    %10 = arith.truncf %9 : vector<128x32xf32> to vector<128x32xbf16>
    %c0_5 = arith.constant 0 : index
    %c0_6 = arith.constant 0 : index
    %11 = vector.load %arg4[%c0_5, %c0_6] : memref<32x128xbf16, #tpu.memory_space<vmem>>, vector<32x128xbf16>
    %cst_7 = arith.constant dense<0.000000e+00> : vector<128x128xf32>
    %12 = tpu.matmul %10, %11, %cst_7 {dimension_numbers = #tpu.dot_dimension_numbers<[1], [0], [0], [1], [0, 0, 1, 1], [], []>} : vector<128x32xbf16>, vector<32x128xbf16>, vector<128x128xf32> -> vector<128x128xf32>
    %c0_8 = arith.constant 0 : index
    %c0_9 = arith.constant 0 : index
    %13 = vector.load %arg5[%c0_8, %c0_9] : memref<128x128xf32, #tpu.memory_space<vmem>>, vector<128x128xf32>
    tpu.vector_store %arg5[%c0_8, %c0_9], %12 {strides = array<i32>} : memref<128x128xf32, #tpu.memory_space<vmem>>, vector<128x128xf32>,
    return
  }
  func.func @transform_0(%arg0: i32) -> (i32, i32) {
    %c0_i32 = arith.constant 0 : i32
    %c0_i32_0 = arith.constant 0 : i32
    return %arg0, %c0_i32 : i32, i32
  }
  func.func @transform_1(%arg0: i32) -> (i32, i32) {
    %c0_i32 = arith.constant 0 : i32
    %c0_i32_0 = arith.constant 0 : i32
    %c0_i32_1 = arith.constant 0 : i32
    return %c0_i32, %c0_i32_0 : i32, i32
  }
  func.func @transform_2(%arg0: i32) -> (i32, i32) {
    %c0_i32 = arith.constant 0 : i32
    %c0_i32_0 = arith.constant 0 : i32
    %c0_i32_1 = arith.constant 0 : i32
    return %c0_i32, %c0_i32_0 : i32, i32
  }
  func.func @transform_3(%arg0: i32) -> (i32, i32) {
    %c0_i32 = arith.constant 0 : i32
    %c0_i32_0 = arith.constant 0 : i32
    %c0_i32_1 = arith.constant 0 : i32
    return %c0_i32, %c0_i32_0 : i32, i32
  }
  func.func @transform_4(%arg0: i32) -> (i32, i32) {
    %c0_i32 = arith.constant 0 : i32
    %c0_i32_0 = arith.constant 0 : i32
    return %arg0, %c0_i32 : i32, i32
  }
}

</mosaic_0001>

<bundles_post_ra>
// kernel: tile.13
= control target key start
LH: loop header
LB: loop body
LE: loop exit
PB: predicated region body
PF: predicated region fallthrough
CT: control target
= control target key end

     0   :  { %s22_s0 = inlined_call_operand.vmem [shape: f32[8], index: 0, kind: input, shape index: {}]   ;;  %s23_s1 = inlined_call_operand.vmem [shape: f32[4,8], index: 1, kind: output, shape index: {}]  }
   0x1   :  { %v4_v0 = vld [vmem:[%s22_s0] ss:$0 sm:$0xff] }
   0x2   :  { %5 = vst [vmem:[%s23_s1] sm:$0xf] %v4_v0 }

// kernel: tile.14
= control target key start
LH: loop header
LB: loop body
LE: loop exit
PB: predicated region body
PF: predicated region fallthrough
CT: control target
= control target key end

     0   :  { %vm7_vm0 = vcmask 64512   ;;  %s37_s8 = smov 8   ;;  %s38_s9 = smov 16   ;;  %vm13_vm1 = vcmask 261312   ;;  %vm19_vm2 = vcmask 195712   ;;  %vm25_vm3 = vcmask 130112   ;;  %s55_s0 = inlined_call_operand.vmem [shape: f32[4,8], index: 0, kind: input, shape index: {}]   ;;  %s56_s1 = inlined_call_operand.vmem [shape: f32[1,32], index: 1, kind: output, shape index: {}]  }
   0x1   :  { %v4_v0 = vld [vmem:[%s55_s0] sm:$0xf]  ;;  %s36_s0 = smov 24  }
   0x2   :  { %5 = vst [vmem:[#allocation1] sm:$0xf] %v4_v0 }
   0x9   :  { %v10_v1 = vld [vmem:[#allocation1 + $0x3] sm:$0x1]   ;;  %v22_v2 = vld [vmem:[#allocation1 + $0x1] sm:$0x1]   ;;  %v6_v3 = vld [vmem:[#allocation1] sm:$0x1]  }
   0xa   :  { %11 = vrot.lane.b32.xlu0 %v10_v1, %s36_s0  ;;  %23 = vrot.lane.b32.xlu1 %v22_v2, %s37_s8  ;;  %v16_v4 = vld [vmem:[#allocation1 + $0x2] sm:$0x1]   ;;  %8 = vst.msk [vmem:[#allocation0] sm:$0x1] %vm7_vm0, %v6_v3  }
   0xe   :  { %17 = vrot.lane.b32.xlu0 %v16_v4, %s38_s9 }
  0x7c   :  { %v12_v5 = vpop.permute.xlu0 %11   ;;  %v24_v6 = vpop.permute.xlu1 %23  }
  0x7d   :  { %14 = vst.msk [vmem:[#allocation0] sm:$0x1] %vm13_vm1, %v12_v5  }
  0x80   :  { %v18_v7 = vpop.permute.xlu0 %17  }
  0x81   :  { %20 = vst.msk [vmem:[#allocation0] sm:$0x1] %vm19_vm2, %v18_v7  }
  0x82   :  { %26 = vst.msk [vmem:[#allocation0] sm:$0x1] %vm25_vm3, %v24_v6  }
  0x89   :  { %v30_v8 = vld [vmem:[#allocation0] sm:$0x1] }
  0x8a   :  { %32 = vst [vmem:[%s56_s1] sm:$0x1] %v30_v8 }

// kernel: transition_layer.1
= control target key start
LH: loop header
LB: loop body
LE: loop exit
PB: predicated region body
PF: predicated region fallthrough
CT: control target
= control target key end

     0   :  { %vm136_vm0 = vcmask 261120   ;;  %s518_s3 = inlined_call_operand.vmem [shape: bf16[32,128], index: 3, kind: input, shape index: {}]   ;;  %s519_s0 = inlined_call_operand.vmem [shape: bf16[128,32], index: 0, kind: input, shape index: {}]   ;;  %s520_s1 = inlined_call_operand.vmem [shape: f32[1,32], index: 1, kind: input, shape index: {}]   ;;  %s521_s2 = inlined_call_operand.vmem [shape: f32[1,32], index: 2, kind: input, shape index: {}]   ;;  %s522_s4 = inlined_call_operand.vmem [shape: f32[128,128], index: 4, kind: output, shape index: {}]  }
   0x1   :  { %v363_v0 = vld [vmem:[%s518_s3] sm:$0xff]   ;;  %v364_v1 = vld [vmem:[%s518_s3 + $0x8] sm:$0xff]   ;;  %v323_v14 = vld [vmem:[%s519_s0 + $0x10] sm:$0xff]  }
   0x2   :  { %339 = vmatprep.subr.bf16.mxu0 %v363_v0  ;;  %359 = vmatprep.subr.bf16.mxu1 %v363_v0  ;;  %v291_v2 = vld [vmem:[%s519_s0] sm:$0xff]   ;;  %v322_v7 = vld [vmem:[%s519_s0 + $0x8] sm:$0xff]   ;;  %v300_v26 = vunpack.c.l.bf16 %v323_v14  ;;  %v327_v35 = vld [vmem:[%s519_s0 + $0x30] sm:$0xff]   ;;  %v301_v44 = vunpack.c.h.bf16 %v323_v14 }
   0x3   :  { %v402_v3 = vld [vmem:[%s520_s1] ss:$0 sm:$0xff]  ;;  %340 = vmatpush3.bf16.msra.mxu0 %v363_v0  ;;  %361 = vmatpush3.bf16.msra.mxu1 %v363_v0  ;;  %v292_v4 = vunpack.c.l.bf16 %v291_v2  ;;  %v293_v5 = vunpack.c.h.bf16 %v291_v2  ;;  %v326_v8 = vld [vmem:[%s519_s0 + $0x28] sm:$0xff]   ;;  %v296_v12 = vunpack.c.l.bf16 %v322_v7  ;;  %v297_v13 = vunpack.c.h.bf16 %v322_v7  ;;  %v324_v40 = vld [vmem:[%s519_s0 + $0x18] sm:$0xff]  }
   0x4   :  { %v325_v6 = vld [vmem:[%s519_s0 + $0x20] sm:$0xff]   ;;  %341 = vmatprep.subr.bf16.mxu0 %v364_v1  ;;  %360 = vmatprep.subr.bf16.mxu1 %v364_v1  ;;  %v312_v17 = vunpack.c.l.bf16 %v326_v8  ;;  %v313_v18 = vunpack.c.h.bf16 %v326_v8  ;;  %v328_v45 = vld [vmem:[%s519_s0 + $0x38] sm:$0xff]   ;;  %v61_v48 = vmul.f32 %v300_v26, %v402_v3  ;;  %v316_v49 = vunpack.c.l.bf16 %v327_v35 }
   0x5   :  { %v416_v9 = vld [vmem:[%s521_s2] ss:$0 sm:$0xff]  ;;  %v308_v10 = vunpack.c.l.bf16 %v325_v6  ;;  %v309_v11 = vunpack.c.h.bf16 %v325_v6  ;;  %v57_v15 = vmul.f32 %v292_v4, %v402_v3  ;;  %v58_v16 = vmul.f32 %v293_v5, %v402_v3 }
   0x6   :  { %v59_v21 = vmul.f32 %v296_v12, %v402_v3  ;;  %v60_v22 = vmul.f32 %v297_v13, %v402_v3  ;;  %v67_v25 = vmul.f32 %v312_v17, %v402_v3  ;;  %v68_v33 = vmul.f32 %v313_v18, %v402_v3 }
   0x7   :  { %v65_v19 = vmul.f32 %v308_v10, %v402_v3  ;;  %v66_v20 = vmul.f32 %v309_v11, %v402_v3  ;;  %342 = vmatpush3.bf16.msra.mxu0 %v364_v1  ;;  %362 = vmatpush3.bf16.msra.mxu1 %v364_v1  ;;  %v80_v23 = vadd.f32 %v416_v9, %v57_v15  ;;  %v317_v52 = vunpack.c.h.bf16 %v327_v35 }
   0x8   :  { %v81_v24 = vadd.f32 %v416_v9, %v58_v16  ;;  %v82_v29 = vadd.f32 %v416_v9, %v59_v21  ;;  %v83_v30 = vadd.f32 %v416_v9, %v60_v22  ;;  %v90_v34 = vadd.f32 %v416_v9, %v67_v25 }
   0x9   :  { %v88_v27 = vadd.f32 %v416_v9, %v65_v19  ;;  %v89_v28 = vadd.f32 %v416_v9, %v66_v20  ;;  %v96_v31 = vmax.f32 %v80_v23, 0.0  ;;  %v91_v42 = vadd.f32 %v416_v9, %v68_v33 }
   0xa   :  { %v97_v32 = vmax.f32 %v81_v24, 0.0  ;;  %v98_v38 = vmax.f32 %v82_v29, 0.0  ;;  %v99_v39 = vmax.f32 %v83_v30, 0.0  ;;  %v106_v43 = vmax.f32 %v90_v34, 0.0 }
   0xb   :  { %v104_v36 = vmax.f32 %v88_v27, 0.0  ;;  %v105_v37 = vmax.f32 %v89_v28, 0.0  ;;  %v107_v50 = vmax.f32 %v91_v42, 0.0  ;;  %v62_v51 = vmul.f32 %v301_v44, %v402_v3 }
   0xc   :  { %v112_v41 = vpack.c.bf16 %v97_v32, %v96_v31  ;;  %v113_v47 = vpack.c.bf16 %v99_v39, %v98_v38  ;;  %v304_v53 = vunpack.c.l.bf16 %v324_v40  ;;  %v84_v54 = vadd.f32 %v416_v9, %v61_v48 }
   0xd   :  { %v116_v46 = vpack.c.bf16 %v105_v37, %v104_v36  ;;  %v69_v55 = vmul.f32 %v316_v49, %v402_v3  ;;  %v305_v56 = vunpack.c.h.bf16 %v324_v40  ;;  %v320_v57 = vunpack.c.l.bf16 %v328_v45 }
   0xe   :  { %343 = vmatprep.mubr.msk.bf16.mxu0 %vm136_vm0, %v112_v41  ;;  %v117_v58 = vpack.c.bf16 %v107_v50, %v106_v43  ;;  %v85_v59 = vadd.f32 %v416_v9, %v62_v51  ;;  %v70_v60 = vmul.f32 %v317_v52, %v402_v3  ;;  %v63_v61 = vmul.f32 %v304_v53, %v402_v3 }
   0xf   :  { %351 = vmatprep.mubr.msk.bf16.mxu1 %vm136_vm0, %v116_v46  ;;  %344 = vmatmul.mubr.msk.bf16.vlgmr.msra.gmra.mrb[0].mxu0 %vm136_vm0, %v113_v47  ;;  %v100_v62 = vmax.f32 %v84_v54, 0.0  ;;  %v92_v63 = vadd.f32 %v416_v9, %v69_v55  ;;  %v64_v0 = vmul.f32 %v305_v56, %v402_v3  ;;  %v321_v1 = vunpack.c.h.bf16 %v328_v45 }
  0x10   :  { %352 = vmatmul.mubr.msk.bf16.vlgmr.msra.gmra.mrb[0].mxu1 %vm136_vm0, %v117_v58  ;;  %v101_v2 = vmax.f32 %v85_v59, 0.0  ;;  %v93_v4 = vadd.f32 %v416_v9, %v70_v60  ;;  %v86_v5 = vadd.f32 %v416_v9, %v63_v61  ;;  %v71_v6 = vmul.f32 %v320_v57, %v402_v3 }
  0x11   :  { %v108_v7 = vmax.f32 %v92_v63, 0.0  ;;  %v87_v8 = vadd.f32 %v416_v9, %v64_v0  ;;  %v72_v10 = vmul.f32 %v321_v1, %v402_v3 }
  0x12   :  { %v114_v11 = vpack.c.bf16 %v101_v2, %v100_v62  ;;  %v109_v12 = vmax.f32 %v93_v4, 0.0  ;;  %v102_v13 = vmax.f32 %v86_v5, 0.0  ;;  %v94_v14 = vadd.f32 %v416_v9, %v71_v6 }
  0x13   :  { %v103_v15 = vmax.f32 %v87_v8, 0.0  ;;  %v95_v16 = vadd.f32 %v416_v9, %v72_v10 }
  0x14   :  { %347 = vmatprep.mubr.msk.bf16.mxu0 %vm136_vm0, %v114_v11  ;;  %v118_v17 = vpack.c.bf16 %v109_v12, %v108_v7  ;;  %v110_v18 = vmax.f32 %v94_v14, 0.0 }
  0x15   :  { %v115_v19 = vpack.c.bf16 %v103_v15, %v102_v13  ;;  %v111_v20 = vmax.f32 %v95_v16, 0.0 }
  0x16   :  { %355 = vmatprep.mubr.msk.bf16.mxu1 %vm136_vm0, %v118_v17 }
  0x17   :  { %348 = vmatmul.mubr.msk.bf16.gmra.mrb[4].mxu0 %vm136_vm0, %v115_v19  ;;  %v119_v21 = vpack.c.bf16 %v111_v20, %v110_v18 }
  0x19   :  { %356 = vmatmul.mubr.msk.bf16.gmra.mrb[4].mxu1 %vm136_vm0, %v119_v21 }
  0xe2   :  { %v345_v3 = vpop.f32.mrb[0].mxu0 }
  0xe3   :  { %260 = vst [vmem:[%s522_s4 + $0x10] sm:$0xff] %v345_v3  ;;  %v195_v22 = vpop.f32.mrb[1].mxu0  ;;  %v353_v23 = vpop.f32.mrb[0].mxu1 }
  0xe4   :  { %258 = vst [vmem:[%s522_s4] sm:$0xff] %v195_v22  ;;  %v346_v9 = vpop.f32.mrb[2].mxu0  ;;  %268 = vst [vmem:[%s522_s4 + $0x50] sm:$0xff] %v353_v23  ;;  %v227_v25 = vpop.f32.mrb[1].mxu1 }
  0xe5   :  { %261 = vst [vmem:[%s522_s4 + $0x18] sm:$0xff] %v346_v9  ;;  %v198_v24 = vpop.f32.mrb[3].mxu0  ;;  %266 = vst [vmem:[%s522_s4 + $0x40] sm:$0xff] %v227_v25  ;;  %v354_v26 = vpop.f32.mrb[2].mxu1 }
  0xe6   :  { %259 = vst [vmem:[%s522_s4 + $0x8] sm:$0xff] %v198_v24  ;;  %269 = vst [vmem:[%s522_s4 + $0x58] sm:$0xff] %v354_v26  ;;  %v230_v27 = vpop.f32.mrb[3].mxu1 }
  0xe7   :  { %267 = vst [vmem:[%s522_s4 + $0x48] sm:$0xff] %v230_v27 }
  0xea   :  { %v349_v28 = vpop.f32.mrb[4].mxu0 }
  0xeb   :  { %264 = vst [vmem:[%s522_s4 + $0x30] sm:$0xff] %v349_v28  ;;  %v211_v29 = vpop.f32.mrb[5].mxu0 }
  0xec   :  { %v357_v30 = vpop.f32.mrb[4].mxu1  ;;  %262 = vst [vmem:[%s522_s4 + $0x20] sm:$0xff] %v211_v29  ;;  %v350_v31 = vpop.f32.mrb[6].mxu0 }
  0xed   :  { %272 = vst [vmem:[%s522_s4 + $0x70] sm:$0xff] %v357_v30  ;;  %v243_v32 = vpop.f32.mrb[5].mxu1  ;;  %265 = vst [vmem:[%s522_s4 + $0x38] sm:$0xff] %v350_v31  ;;  %v214_v33 = vpop.f32.mrb[7].mxu0 }
  0xee   :  { %270 = vst [vmem:[%s522_s4 + $0x60] sm:$0xff] %v243_v32  ;;  %v358_v34 = vpop.f32.mrb[6].mxu1  ;;  %263 = vst [vmem:[%s522_s4 + $0x28] sm:$0xff] %v214_v33 }
  0xef   :  { %273 = vst [vmem:[%s522_s4 + $0x78] sm:$0xff] %v358_v34  ;;  %v246_v35 = vpop.f32.mrb[7].mxu1 }
  0xf0   :  { %271 = vst [vmem:[%s522_s4 + $0x68] sm:$0xff] %v246_v35 }

</bundles_post_ra>
